<compile_context>
chip_gen: v5e
topology: v5e:2x2
jax: 0.10.0
libtpu: 0.0.40
codegen_flags: <defaults>
</compile_context>

<pallas_src>
import functools
import math

import jax
import jax.numpy as jnp
from jax.experimental import pallas as pl
from jax.experimental.pallas import tpu as pltpu


def _disp_upsample_kernel(dd_ref, dx_ref, ef_ref, e_ref, out_ref, *,
                          up, center, w_up):
    """One (batch, H-tile) step: [h_t, *] tile maps -> [h_t, up*w_up] disparity."""
    # Lane (column) NN-expansion: a[h, w*up+j] = scale*disp[h,w] + (j-center)*dy[h,w]
    a = jnp.dot(dd_ref[...], ef_ref[...], preferred_element_type=jnp.float32)
    # Expanded dx (coefficient of the row offset): b[h, w*up+j] = dx[h, w]
    b = jnp.dot(dx_ref[...], e_ref[...], preferred_element_type=jnp.float32)
    # Sublane (row) expansion: `up` lane-dense slabs, one VPU FMA each.
    for i in range(up):
        out_ref[:, i * w_up:(i + 1) * w_up] = a + (float(i) - center) * b


def _vmem_capacity_bytes():
    try:
        return int(pltpu.get_tpu_info().vmem_capacity_bytes)
    except Exception:
        return 64 * 1024 * 1024  # conservative default (v7x per-TensorCore)


def _pick_h_tile(H, W_pad, up, B, vmem_cap):
    """Largest multiple-of-8 H tile that (a) keeps double-buffered blocks plus
    constants well under VMEM capacity, (b) caps the output block at ~16 MiB,
    and (c) leaves >= ceil(4/B) grid steps over H (dual-TC sharding on v7x)."""
    w_up_p = W_pad * up
    out_row = up * w_up_p * 4              # output-block bytes per tile row (f32)
    in_row = 3 * W_pad * 4                 # dd + dx block bytes per tile row
    const_bytes = 3 * W_pad * w_up_p * 4   # EF + E constants
    target = min(vmem_cap // 2, 48 * 1024 * 1024)
    avail = max(2 * 8 * out_row, target - 2 * const_bytes)
    h_t = avail // (2 * (out_row + in_row))
    h_t = min(h_t, max(8, (16 * 1024 * 1024) // out_row))     # 8-16 MiB block cap
    min_steps = -(-4 // max(B, 1))                             # ceil(4 / B)
    h_t = min(h_t, -(-H // min_steps))
    return max(8, int(h_t) // 8 * 8)


def disp_upsample_by_slanted_plane(tile_disp, tile_dx, tile_dy, upscale, ts=4):
    """tile_disp/tile_dx/tile_dy: [B, 1, H, W] -> [B, 1, H*upscale, W*upscale]."""
    up = int(upscale)
    center = (up - 1) / 2.0
    scale = float(up) / float(ts)

    disp = jnp.squeeze(tile_disp, axis=1).astype(jnp.float32)
    dx = jnp.squeeze(tile_dx, axis=1).astype(jnp.float32)
    dy = jnp.squeeze(tile_dy, axis=1).astype(jnp.float32)
    B, H, W = disp.shape

    # Pad W (only if needed) so each per-i output slab has W_pad*up % 128 == 0.
    m = 128 // math.gcd(128, up)
    W_pad = -(-W // m) * m
    w_up_p = W_pad * up

    vmem_cap = _vmem_capacity_bytes()
    h_t = _pick_h_tile(H, W_pad, up, B, vmem_cap)
    H_pad = -(-H // h_t) * h_t
    n_t = H_pad // h_t

    def pad(x):
        if H_pad == H and W_pad == W:
            return x
        return jnp.pad(x, ((0, 0), (0, H_pad - H), (0, W_pad - W)))

    disp, dx, dy = pad(disp), pad(dx), pad(dy)
    dd = jnp.concatenate([disp, dy], axis=-1)               # [B, H_pad, 2*W_pad]

    # Static one-hot expansion constants (DMA'd once: constant index_map).
    col = jnp.arange(w_up_p, dtype=jnp.int32)
    e = (col[None, :] // up
         == jnp.arange(W_pad, dtype=jnp.int32)[:, None]).astype(jnp.float32)    # [W_pad, w_up_p]
    j_off = (col % up).astype(jnp.float32) - center
    ef = jnp.concatenate([scale * e, e * j_off[None, :]], axis=0)                # [2*W_pad, w_up_p]

    # Resident-VMEM estimate -> compiler limit (leave headroom on v7x's 64 MiB).
    out_row = up * w_up_p * 4
    in_row = 3 * W_pad * 4
    const_bytes = 3 * W_pad * w_up_p * 4
    resident = 2 * h_t * (out_row + in_row) + 2 * const_bytes
    vmem_limit = int(min(3 * vmem_cap // 4,
                         max(32 * 1024 * 1024, resident + (16 << 20))))

    kernel = functools.partial(_disp_upsample_kernel,
                               up=up, center=center, w_up=w_up_p)

    out = pl.pallas_call(
        kernel,
        out_shape=jax.ShapeDtypeStruct((B, H_pad, up * w_up_p), jnp.float32),
        grid=(B, n_t),
        in_specs=[
            pl.BlockSpec((None, h_t, 2 * W_pad), lambda b, t: (b, t, 0)),   # disp|dy
            pl.BlockSpec((None, h_t, W_pad), lambda b, t: (b, t, 0)),       # dx
            pl.BlockSpec((2 * W_pad, w_up_p), lambda b, t: (0, 0)),         # EF const
            pl.BlockSpec((W_pad, w_up_p), lambda b, t: (0, 0)),             # E const
        ],
        out_specs=pl.BlockSpec((None, h_t, up * w_up_p), lambda b, t: (b, t, 0)),
        compiler_params=pltpu.CompilerParams(
            dimension_semantics=("parallel", "parallel"),
            vmem_limit_bytes=vmem_limit),
    )(dd, dx, ef, e)

    # [B, H_pad, up*W_pad*up] -> [B, H_pad*up, W_pad*up] is a free row-major
    # reshape (already the PixelShuffle layout); then drop any padding.
    out = out.reshape(B, H_pad * up, W_pad * up)
    if H_pad != H or W_pad != W:
        out = out[:, :H * up, :W * up]
    return out[:, None, :, :]


def _reference(tile_disp, tile_dx, tile_dy, upscale, ts=4):
    """Pure-JAX mirror of the PyTorch module (channel cat + PixelShuffle)."""
    up = int(upscale)
    center = (up - 1) / 2.0
    d = tile_disp * (float(up) / float(ts))
    chans = [d + (i - center) * tile_dx + (j - center) * tile_dy
             for i in range(up) for j in range(up)]
    disp0 = jnp.concatenate(chans, axis=1)                   # [B, up*up, H, W]
    B, _, H, W = disp0.shape
    x = disp0.reshape(B, 1, up, up, H, W)
    x = jnp.transpose(x, (0, 1, 4, 2, 5, 3))                 # [B, 1, H, up, W, up]
    return x.reshape(B, 1, H * up, W * up)


if __name__ == "__main__":
    key = jax.random.PRNGKey(0)
    k1, k2, k3 = jax.random.split(key, 3)
    B, H, W = 2, 16, 16
    upscale, ts = 4, 4
    tile_disp = jax.random.uniform(k1, (B, 1, H, W), jnp.float32,
                                   minval=0.0, maxval=8.0)
    tile_dx = jax.random.uniform(k2, (B, 1, H, W), jnp.float32,
                                 minval=-1.0, maxval=1.0)
    tile_dy = jax.random.uniform(k3, (B, 1, H, W), jnp.float32,
                                 minval=-1.0, maxval=1.0)

    out = jax.block_until_ready(
        disp_upsample_by_slanted_plane(tile_disp, tile_dx, tile_dy, upscale, ts))
    expected = jax.block_until_ready(
        _reference(tile_disp, tile_dx, tile_dy, upscale, ts))

    assert out.shape == (B, 1, H * upscale, W * upscale), out.shape
    if not jnp.allclose(out, expected, rtol=1e-4, atol=1e-3):
        raise AssertionError("Pallas kernel mismatch vs JAX reference")
    print("KERNEL_OK")
</pallas_src>

<mosaic_0001>
module attributes {stable_mosaic.version = 11 : i64} {
  func.func @_disp_upsample_kernel(%arg0: i32, %arg1: i32, %arg2: memref<1x8x64xf32, #tpu.memory_space<vmem>>, %arg3: memref<1x8x32xf32, #tpu.memory_space<vmem>>, %arg4: memref<64x128xf32, #tpu.memory_space<vmem>>, %arg5: memref<32x128xf32, #tpu.memory_space<vmem>>, %arg6: memref<1x8x512xf32, #tpu.memory_space<vmem>>) attributes {dimension_semantics = [#tpu.dimension_semantics<parallel>, #tpu.dimension_semantics<parallel>], iteration_bounds = array<i64: 2, 2>, scalar_prefetch = 0 : i64, scratch_operands = 0 : i64, tpu.core_type = #tpu.core_type<tc>, window_params = [{transform_indices = @transform_0, window_bounds = array<i64: 1, 8, 64>}, {transform_indices = @transform_1, window_bounds = array<i64: 1, 8, 32>}, {pipeline_mode = #tpu.pipeline_mode<synchronous>, transform_indices = @transform_2, window_bounds = array<i64: 64, 128>}, {pipeline_mode = #tpu.pipeline_mode<synchronous>, transform_indices = @transform_3, window_bounds = array<i64: 32, 128>}, {transform_indices = @transform_4, window_bounds = array<i64: 1, 8, 512>}]} {
    %c0 = arith.constant 0 : index
    %c0_0 = arith.constant 0 : index
    %c0_1 = arith.constant 0 : index
    %0 = vector.load %arg2[%c0, %c0_0, %c0_1] : memref<1x8x64xf32, #tpu.memory_space<vmem>>, vector<1x8x64xf32>
    %1 = vector.shape_cast %0 : vector<1x8x64xf32> to vector<8x64xf32>
    %c0_2 = arith.constant 0 : index
    %c0_3 = arith.constant 0 : index
    %2 = vector.load %arg4[%c0_2, %c0_3] : memref<64x128xf32, #tpu.memory_space<vmem>>, vector<64x128xf32>
    %cst = arith.constant dense<0.000000e+00> : vector<8x128xf32>
    %3 = tpu.matmul %1, %2, %cst {dimension_numbers = #tpu.dot_dimension_numbers<[1], [0], [0], [1], [0, 0, 1, 1], [], []>} : vector<8x64xf32>, vector<64x128xf32>, vector<8x128xf32> -> vector<8x128xf32>
    %c0_4 = arith.constant 0 : index
    %c0_5 = arith.constant 0 : index
    %c0_6 = arith.constant 0 : index
    %4 = vector.load %arg3[%c0_4, %c0_5, %c0_6] : memref<1x8x32xf32, #tpu.memory_space<vmem>>, vector<1x8x32xf32>
    %5 = vector.shape_cast %4 : vector<1x8x32xf32> to vector<8x32xf32>
    %c0_7 = arith.constant 0 : index
    %c0_8 = arith.constant 0 : index
    %6 = vector.load %arg5[%c0_7, %c0_8] : memref<32x128xf32, #tpu.memory_space<vmem>>, vector<32x128xf32>
    %cst_9 = arith.constant dense<0.000000e+00> : vector<8x128xf32>
    %7 = tpu.matmul %5, %6, %cst_9 {dimension_numbers = #tpu.dot_dimension_numbers<[1], [0], [0], [1], [0, 0, 1, 1], [], []>} : vector<8x32xf32>, vector<32x128xf32>, vector<8x128xf32> -> vector<8x128xf32>
    %cst_10 = arith.constant -1.500000e+00 : f32
    %8 = vector.broadcast %cst_10 : f32 to vector<8x128xf32>
    %9 = arith.mulf %8, %7 : vector<8x128xf32>
    %10 = arith.addf %3, %9 : vector<8x128xf32>
    %c0_11 = arith.constant 0 : index
    %c0_12 = arith.constant 0 : index
    %c0_13 = arith.constant 0 : index
    %11 = vector.load %arg6[%c0_11, %c0_12, %c0_13] : memref<1x8x512xf32, #tpu.memory_space<vmem>>, vector<1x8x128xf32>
    %12 = vector.shape_cast %11 : vector<1x8x128xf32> to vector<8x128xf32>
    %13 = vector.shape_cast %10 : vector<8x128xf32> to vector<1x8x128xf32>
    tpu.vector_store %arg6[%c0_11, %c0_12, %c0_13], %13 {strides = array<i32>} : memref<1x8x512xf32, #tpu.memory_space<vmem>>, vector<1x8x128xf32>,
    %cst_14 = arith.constant -5.000000e-01 : f32
    %14 = vector.broadcast %cst_14 : f32 to vector<8x128xf32>
    %15 = arith.mulf %14, %7 : vector<8x128xf32>
    %16 = arith.addf %3, %15 : vector<8x128xf32>
    %c0_15 = arith.constant 0 : index
    %c0_16 = arith.constant 0 : index
    %c128 = arith.constant 128 : index
    %17 = vector.load %arg6[%c0_15, %c0_16, %c128] : memref<1x8x512xf32, #tpu.memory_space<vmem>>, vector<1x8x128xf32>
    %18 = vector.shape_cast %17 : vector<1x8x128xf32> to vector<8x128xf32>
    %19 = vector.shape_cast %16 : vector<8x128xf32> to vector<1x8x128xf32>
    tpu.vector_store %arg6[%c0_15, %c0_16, %c128], %19 {strides = array<i32>} : memref<1x8x512xf32, #tpu.memory_space<vmem>>, vector<1x8x128xf32>,
    %cst_17 = arith.constant 5.000000e-01 : f32
    %20 = vector.broadcast %cst_17 : f32 to vector<8x128xf32>
    %21 = arith.mulf %20, %7 : vector<8x128xf32>
    %22 = arith.addf %3, %21 : vector<8x128xf32>
    %c0_18 = arith.constant 0 : index
    %c0_19 = arith.constant 0 : index
    %c256 = arith.constant 256 : index
    %23 = vector.load %arg6[%c0_18, %c0_19, %c256] : memref<1x8x512xf32, #tpu.memory_space<vmem>>, vector<1x8x128xf32>
    %24 = vector.shape_cast %23 : vector<1x8x128xf32> to vector<8x128xf32>
    %25 = vector.shape_cast %22 : vector<8x128xf32> to vector<1x8x128xf32>
    tpu.vector_store %arg6[%c0_18, %c0_19, %c256], %25 {strides = array<i32>} : memref<1x8x512xf32, #tpu.memory_space<vmem>>, vector<1x8x128xf32>,
    %cst_20 = arith.constant 1.500000e+00 : f32
    %26 = vector.broadcast %cst_20 : f32 to vector<8x128xf32>
    %27 = arith.mulf %26, %7 : vector<8x128xf32>
    %28 = arith.addf %3, %27 : vector<8x128xf32>
    %c0_21 = arith.constant 0 : index
    %c0_22 = arith.constant 0 : index
    %c384 = arith.constant 384 : index
    %29 = vector.load %arg6[%c0_21, %c0_22, %c384] : memref<1x8x512xf32, #tpu.memory_space<vmem>>, vector<1x8x128xf32>
    %30 = vector.shape_cast %29 : vector<1x8x128xf32> to vector<8x128xf32>
    %31 = vector.shape_cast %28 : vector<8x128xf32> to vector<1x8x128xf32>
    tpu.vector_store %arg6[%c0_21, %c0_22, %c384], %31 {strides = array<i32>} : memref<1x8x512xf32, #tpu.memory_space<vmem>>, vector<1x8x128xf32>,
    return
  }
  func.func @transform_0(%arg0: i32, %arg1: i32) -> (i32, i32, i32) {
    %c0_i32 = arith.constant 0 : i32
    %c0_i32_0 = arith.constant 0 : i32
    return %arg0, %arg1, %c0_i32 : i32, i32, i32
  }
  func.func @transform_1(%arg0: i32, %arg1: i32) -> (i32, i32, i32) {
    %c0_i32 = arith.constant 0 : i32
    %c0_i32_0 = arith.constant 0 : i32
    return %arg0, %arg1, %c0_i32 : i32, i32, i32
  }
  func.func @transform_2(%arg0: i32, %arg1: i32) -> (i32, i32) {
    %c0_i32 = arith.constant 0 : i32
    %c0_i32_0 = arith.constant 0 : i32
    %c0_i32_1 = arith.constant 0 : i32
    return %c0_i32, %c0_i32_0 : i32, i32
  }
  func.func @transform_3(%arg0: i32, %arg1: i32) -> (i32, i32) {
    %c0_i32 = arith.constant 0 : i32
    %c0_i32_0 = arith.constant 0 : i32
    %c0_i32_1 = arith.constant 0 : i32
    return %c0_i32, %c0_i32_0 : i32, i32
  }
  func.func @transform_4(%arg0: i32, %arg1: i32) -> (i32, i32, i32) {
    %c0_i32 = arith.constant 0 : i32
    %c0_i32_0 = arith.constant 0 : i32
    return %arg0, %arg1, %c0_i32 : i32, i32, i32
  }
}

</mosaic_0001>

<bundles_post_ra>
// kernel: tpu_custom_call.1
= control target key start
LH: loop header
LB: loop body
LE: loop exit
PB: predicated region body
PF: predicated region fallthrough
CT: control target
= control target key end

     0   :  { %s1112_s0 = inlined_call_operand.hbm [shape: f32[2,16,64], index: 0, kind: input, shape index: {}]   ;;  %s1113_s1 = inlined_call_operand.hbm [shape: f32[2,16,32], index: 1, kind: input, shape index: {}]   ;;  %s1114_s2 = inlined_call_operand.hbm [shape: f32[64,128], index: 2, kind: input, shape index: {}]   ;;  %s1115_s3 = inlined_call_operand.hbm [shape: f32[32,128], index: 3, kind: input, shape index: {}]   ;;  %s1116_s4 = inlined_call_operand.hbm [shape: f32[2,16,512], index: 4, kind: output, shape index: {}]  }
   0x1   :  { %1122 = sst [smem:[#allocation21_spill]] %s1114_s2 }
   0x2   :  { %1123 = sst [smem:[#allocation22_spill]] %s1115_s3 }
   0x3   :  { %9 = vsyncpa [#allocation3], 0 }
   0x4   :  { %11 = vsyncpa [#allocation3 + $0x1], 0 }
   0x5   :  { %12 = vsyncpa [#allocation6], 0 }
   0x6   :  { %14 = vsyncpa [#allocation6 + $0x1], 0 }
   0x7   :  { %15 = vsyncpa [#allocation9], 0 }
   0x8   :  { %16 = vsyncpa [#allocation4], 0 }
   0x9   :  { %18 = vsyncpa [#allocation4 + $0x1], 0  ;;  %s925_s15 = smov 0   ;;  %s927_s16 = smov 0  }
   0xa   :  { %s929_s17 = smov 0   ;;  %s931_s18 = smov 0  }
   0xb   :  { %s933_s19 = smov 0   ;;  %s935_s20 = smov 0  }
   0xc   :  { %s937_s21 = smov 0   ;;  %s939_s22 = smov 0  }
   0xd LB: > { %1124 = sst [smem:[#allocation16_spill]] %s886_s20  ;;  %s966_s23 = sadd.s32 4294967295, %s894_s22   ;;  %s894_s22 = sphi %s939_s22, %s24_s22   ;;  %s890_s21 = sphi %s937_s21, %s1140_s21   ;;  %s886_s20 = sphi %s935_s20, %s1139_s20   ;;  %s882_s19 = sphi %s933_s19, %s1138_s19   ;;  %s878_s18 = sphi %s931_s18, %s1137_s18   ;;  %s874_s17 = sphi %s929_s17, %s1143_s17   ;;  %s870_s16 = sphi %s927_s16, %s1142_s16   ;;  %s866_s15 = sphi %s925_s15, %s1141_s15  }
   0xe   : > { %1125 = sst [smem:[#allocation17_spill]] %s890_s21  ;;  %p534_p0 = scmp.ge.s32.totalorder %s894_s22, 1 }
   0xf   : > { %p59_p1 = scmp.eq.s32.totalorder %s966_s23, 0  ;;  %p167_p2 = scmp.lt.s32.totalorder %s894_s22, 5 }
  0x10   : > { %s1126_s2 = sld [smem:[#allocation21_spill]]  ;;  %s896_s28 = smov [#allocation7]  }
  0x11   : > { %p974_p3 = pnand %p534_p0, %p167_p2  ;;  %s180_s29 = sshll.u32 %s896_s28, 4  ;;  %s181_s29 = int_to_ptr.vmem [resolvable:$true] %s180_s29 }
  0x12   : > { %s1128_s3 = sld [smem:[#allocation22_spill]]  ;;  %s897_s7 = smov 128  }
  0x13   : > { %p572_p4 = pneg %p974_p3  ;;  %s898_s8 = smov 8  }
  0x14   : > { %s899_s9 = smov [#allocation8]   ;;  %s533_s11 = sadd.s32 4294967294, %s894_s22  }
  0x15   : > { %p573_p5 = pnand %p572_p4, %p59_p1  ;;  %s194_s10 = sshll.u32 %s899_s9, 4  ;;  %s195_s10 = int_to_ptr.vmem [resolvable:$true] %s194_s10 }
  0x16   : > { %s178_s26 = sshll.u32 %s1126_s2, 4  ;;  %s33_s12 = sadd.s32 1, %s886_s20  ;;  %s179_s26 = int_to_ptr.hbm [resolvable:$true] %s178_s26 }
  0x17   : > { %575 = dma.hbm_to_vmem [thread:$0]  (!%p573_p5), %s179_s26, 1024, %s181_s29, [#allocation6], %s897_s7, %s897_s7, %s898_s8  }
  0x18   : > { %s192_s6 = sshll.u32 %s1128_s3, 4  ;;  %p34_p6 = scmp.ge.s32.totalorder %s33_s12, 2  ;;  %s193_s6 = int_to_ptr.hbm [resolvable:$true] %s192_s6 }
  0x19   : > { %578 = dma.hbm_to_vmem [thread:$0]  (!%p573_p5), %s193_s6, 512, %s195_s10, [#allocation9], %s897_s7, %s897_s7, %s898_s8  }
  0x1a   : > { %s36_s13 = sadd.s32 1, %s890_s21  ;;  %s45_s14 = sadd.s32 1, %s874_s17 }
  0x1b   : > { %p52_p7 = scmp.ne.s32.totalorder %s874_s17, %s870_s16  ;;  %s1145_s12 = smov (%p34_p6, %s33_s12), 0 }
  0x1c   : > { %1129 = sst [smem:[#allocation18_spill]] %s1145_s12  ;;  %s1147_s13 = smov (!%p34_p6, %s36_s13), %s890_s21 }
  0x1d   : > { %s41_s24 = ssub.s32 %s886_s20, %s1145_s12  ;;  %p53_p8 = scmp.eq.s32.totalorder %s894_s22, 0 }
  0x1e   : > { %p38_p9 = scmp.ge.s32.totalorder %s1147_s13, 2  ;;  %p58_p10 = scmp.ne.s32.totalorder %s870_s16, %s866_s15 }
  0x1f   : > { %p999_p11 = por %p53_p8, %p52_p7  ;;  %p154_p12 = scmp.eq.s32.totalorder %s966_s23, 3 }
  0x20   : > { %s1149_s13 = smov (%p38_p9, %s1147_s13), 0  ;;  %p1008_p13 = por %p59_p1, %p58_p10 }
  0x21   : > { %1131 = sst [smem:[#allocation19_spill]] %s1149_s13  ;;  %p1012_p0 = por %p154_p12, %p52_p7 }
  0x22   : > { %s40_s29 = ssub.s32 %s890_s21, %s1149_s13  ;;  %p160_p2 = scmp.eq.s32.totalorder %s533_s11, 3 }
  0x23   : > { %s42_s30 = sor.u32 %s41_s24, %s40_s29  ;;  %p592_p4 = scmp.lt.s32.totalorder %s894_s22, 4 }
  0x24   : > { %p43_p5 = scmp.eq.s32.totalorder %s42_s30, 0  ;;  %p1019_p6 = por %p160_p2, %p58_p10 }
  0x25   : > { %s208_s6 = sand.u32 1, %s874_s17   ;;  %s539_s7 = sshll.u32 %s890_s21, 1 }
  0x26   : > { %s1134_s5 = scalar_select %p1019_p6, 1, 0 }
  0x27   : > { %s1026_s8 = scalar_select %p43_p5, %s874_s17, %s45_s14  }
  0x28   : > { %1135 = sst [smem:[#allocation20_spill]] %s1134_s5  ;;  %s538_s9 = sshll.u32 %s208_s6, 3 }
  0x29   : > { %s216_s10 = sadd.s32 %s886_s20, %s539_s7  ;;  %s212_s3 = scalar_lea.vmem [#allocation2], %s538_s9 }
  0x2a   : > { %s540_s2 = sshll.u32 %s216_s10, 3  ;;  %s222_s13 = sshll.u32 %s212_s3, 4  ;;  %s223_s13 = int_to_ptr.vmem [resolvable:$true] %s222_s13 }
  0x2b   : > { %s218_s24 = scalar_lea.hbm %s1112_s0, %s540_s2  ;;  %p580_p7 = pnand %p592_p4, %p999_p11 }
  0x2c   : > { %s220_s29 = sshll.u32 %s218_s24, 4  ;;  %s239_s14 = scalar_lea.hbm %s1113_s1, %s540_s2  ;;  %s221_s29 = int_to_ptr.hbm [resolvable:$true] %s220_s29 }
  0x2d   : > { %s209_s21 = scalar_lea.sflag [#allocation3], %s208_s6  ;;  %s229_s7 = sand.u32 1, %s894_s22  }
  0x2e   : > { %582 = dma.hbm_to_vmem [thread:$0]  (!%p580_p7), %s221_s29, 128, %s223_s13, %s209_s21  }
  0x2f   : > { %s241_s10 = sshll.u32 %s239_s14, 4  ;;  %s233_s3 = scalar_lea.vmem [#allocation5], %s538_s9  ;;  %s242_s10 = int_to_ptr.hbm [resolvable:$true] %s241_s10 }
  0x30   : > { %s243_s20 = sshll.u32 %s233_s3, 4  ;;  %s230_s12 = scalar_lea.sflag [#allocation6], %s229_s7  ;;  %s244_s20 = int_to_ptr.vmem [resolvable:$true] %s243_s20 }
  0x31   : > { %585 = dma.hbm_to_vmem [thread:$0]  (!%p580_p7), %s242_s10, 128, %s244_s20, %s230_s12  }
  0x32   : > { %252 = sbr.rel (%p974_p3) target bundleno = 213 (0xd5), region = 36  ;;  %s1043_s25 = sand.u32 (!%p974_p3), 1, %s870_s16  }
  0x33   : > { %s545_s2 = sshll.u32 (!%p974_p3), %s1043_s25, 3  ;;  %s255_s5 = scalar_lea.sflag (!%p974_p3), [#allocation3], %s1043_s25 }
  0x34   : > { %s1047_s21 = scalar_lea.vmem (!%p974_p3), [#allocation2], %s545_s2 }
  0x37   : > { %845 = dma.done.wait (%p1008_p13), %s255_s5, 128  }
  0x38   : > { %847 = vsyncadd (%p1008_p13), %s255_s5, 4294967168  ;;  %s264_s20 = sand.u32 1, %s966_s23   ;;  %s268_s13 = scalar_lea.vmem [#allocation5], %s545_s2 }
  0x39   : > { %s265_s27 = scalar_lea.sflag [#allocation6], %s264_s20 }
  0x3a   : > { %849 = dma.done.wait (%p1008_p13), %s265_s27, 128  }
  0x3b   : > { %851 = vsyncadd (%p1008_p13), %s265_s27, 4294967168 }
  0x3c   : > { %853 = dma.done.wait (%p59_p1), [#allocation6], 1024  }
  0x3d   : > { %855 = vsyncadd (%p59_p1), [#allocation6], 4294966272 }
  0x3e   : > { %857 = dma.done.wait (%p59_p1), [#allocation9], 512  }
  0x3f   : > { %859 = vsyncadd (%p59_p1), [#allocation9], 4294966784  ;;  %v317_v0 = vld [vmem:[#allocation7 + $0x38] sm:$0xff]  ;;  %v316_v1 = vld [vmem:[#allocation7 + $0x30] sm:$0xff]  ;;  %vm347_vm0 = vcmask 261120   ;;  %vm318_vm1 = vcmask 523264  }
  0x40   : > { %330 = vmatpush.msra.mxu0 %v317_v0  ;;  %v346_v2 = vld [vmem:[#allocation8 + $0x18] sm:$0xff]  ;;  %v315_v3 = vld [vmem:[#allocation7 + $0x28] sm:$0xff]  ;;  %v345_v4 = vld [vmem:[#allocation8 + $0x10] sm:$0xff]  ;;  %s553_s23 = sshll.u32 %s878_s18, 2  ;;  %s554_s26 = sshll.u32 %s882_s19, 3 }
  0x41   : > { %363 = vmatpush.msra.mxu1 %v346_v2  ;;  %v344_v5 = vld [vmem:[#allocation8 + $0x8] sm:$0xff]  ;;  %v314_v6 = vld [vmem:[#allocation7 + $0x20] sm:$0xff]  ;;  %v313_v8 = vld [vmem:[#allocation7 + $0x18] sm:$0xff]  ;;  %s395_s6 = sadd.s32 %s554_s26, %s553_s23  ;;  %s549_s9 = sshll.u32 %s1043_s25, 5 }
  0x42   : > { %331 = vmatpush.msra.mxu0 %v316_v1  ;;  %v343_v7 = vld [vmem:[#allocation8] sm:$0xff]  ;;  %v342_v9 = vld [vmem:[%s268_s13] sm:$0xff]  ;;  %v311_v11 = vld [vmem:[#allocation7 + $0x8] sm:$0xff]  ;;  %s555_s11 = sshll.u32 %s395_s6, 3  ;;  %s308_s18 = scalar_lea.vmem [#allocation10], %s549_s9 }
  0x43   : > { %364 = vmatpush.msra.mxu1 %v345_v4  ;;  %v312_v10 = vld [vmem:[#allocation7 + $0x10] sm:$0xff]  ;;  %v310_v12 = vld [vmem:[#allocation7] sm:$0xff]  ;;  %s397_s30 = scalar_lea.hbm %s1116_s4, %s555_s11  ;;  %s399_s19 = sshll.u32 %s308_s18, 4  ;;  %s400_s19 = int_to_ptr.vmem [resolvable:$true] %s399_s19 }
  0x44   : > { %332 = vmatpush.msra.mxu0 %v315_v3  ;;  %v309_v13 = vld [vmem:[%s1047_s21] sm:$0xff]  ;;  %s401_s14 = sshll.u32 %s397_s30, 4  ;;  %s384_s7 = scalar_lea.sflag [#allocation4], %s1043_s25  ;;  %s402_s14 = int_to_ptr.hbm [resolvable:$true] %s401_s14 }
  0x45   : > { %365 = vmatpush.msra.mxu1 %v344_v5  ;;  %s798_s10 = sshra.s32 %s402_s14, 4  ;;  %s804_s5 = scalar_lea.hbm %s1116_s4, 128  ;;  %s799_s10 = int_to_ptr.hbm [resolvable:$true] %s798_s10 }
  0x46   : > { %333 = vmatpush.msra.mxu0 %v314_v6  ;;  %s800_s3 = scalar_lea.hbm %s799_s10, 32  ;;  %p805_p9 = scmp.lt.s32.totalorder %s799_s10, %s1116_s4 }
  0x47   : > { %366 = vmatpush.msra.mxu1 %v343_v7  ;;  %p801_p1 = scmp.ne.s32.totalorder %s799_s10, %s800_s3  ;;  %p806_p10 = scmp.lt.s32.totalorder %s804_s5, %s800_s3 }
  0x48   : > { %334 = vmatpush.msra.mxu0 %v313_v8  ;;  %551 = vmatmul.msk.f32.vlgmr.msra.gmra.mxu1 %vm347_vm0, %v342_v9 }
  0x49   : > { %p802_p3 = pnand %p801_p1, %p1012_p0  ;;  %p807_p11 = por %p806_p10, %p805_p9 }
  0x4a   : > { %335 = vmatpush.msra.mxu0 %v312_v10 }
  0x4b   : > { %p803_p8 = pneg %p802_p3 }
  0x4c   : > { %336 = vmatpush.msra.mxu0 %v311_v11 }
  0x4d   : > { %p808_p12 = pnand %p807_p11, %p803_p8 }
  0x4e   : > { %337 = vmatpush.msra.mxu0 %v310_v12 }
  0x4f   : > { %550 = vmatmul.msk.f32.vlgmr.msra.gmra.mxu0 %vm318_vm1, %v309_v13 }
  0xc5   : > { %v368_v14 = vpop.f32.mrf.mxu1 }
  0xc6   : > { %v371_v15 = vmul.f32 -1.5, %v368_v14  ;;  %v374_v16 = vmul.f32 -0.5, %v368_v14  ;;  %v377_v17 = vmul.f32 0.5, %v368_v14  ;;  %v380_v18 = vmul.f32 1.5, %v368_v14 }
  0xcc   : > { %v339_v19 = vpop.f32.mrf.mxu0 }
  0xcd   : > { %v372_v20 = vadd.f32 %v371_v15, %v339_v19  ;;  %v375_v21 = vadd.f32 %v374_v16, %v339_v19  ;;  %v378_v22 = vadd.f32 %v377_v17, %v339_v19  ;;  %v381_v23 = vadd.f32 %v380_v18, %v339_v19 }
  0xcf   : > { %373 = vst [vmem:[%s308_s18] sm:$0xff] %v372_v20 }
  0xd0   : > { %376 = vst [vmem:[%s308_s18 + $0x8] sm:$0xff] %v375_v21 }
  0xd1   : > { %379 = vst [vmem:[%s308_s18 + $0x10] sm:$0xff] %v378_v22 }
  0xd2   : > { %382 = vst [vmem:[%s308_s18 + $0x18] sm:$0xff] %v381_v23 }
  0xd3   : > { %811 = shalt.err (!%p808_p12)
}
  0xd4   : > { %570 = dma.vmem_to_hbm [thread:$0]  (%p1012_p0), %s400_s19, 512, %s402_s14, %s384_s7  }
  0xd5 PF: > { %p595_p13 = scmp.ge.s32.totalorder %s894_s22, 2  ;;  %s413_s27 = sand.u32 1, %s866_s15  }
  0xd6   : > { %s414_s13 = scalar_lea.sflag [#allocation4], %s413_s27 }
  0xd7   : > { %p587_p2 = pnand %p595_p13, %p1019_p6 }
  0xd9   : > { %p588_p4 = pneg %p587_p2 }
  0xdb   : > { %861 = dma.done.wait (%p588_p4), %s414_s13, 512  }
  0xdc   : > { %863 = vsyncadd (%p588_p4), %s414_s13, 4294966784  ;;  %s24_s22 = sadd.s32 1, %s894_s22   ;;  %s1137_s18 = sld [smem:[#allocation16_spill]] }
  0xdd   : > { %p21_p5 = scmp.ge.s32.totalorder %s24_s22, 6   ;;  %s1138_s19 = sld [smem:[#allocation17_spill]] }
  0xde   : > { %s1139_s20 = sld [smem:[#allocation18_spill]]  ;;  %s1141_s15 = smov %s870_s16 }
  0xdf   : > { %s1140_s21 = sld [smem:[#allocation19_spill]]  ;;  %s1142_s16 = smov %s874_s17 }
  0xe0   : > { %s1143_s17 = smov %s1026_s8  ;;  %23 = sbr.rel (!%p21_p5) target bundleno = 13 (0xd), region = 102 }
  0xe5   :  { %420 = vsyncpa [#allocation3], 1 }
  0xe6   :  { %422 = vsyncpa [#allocation3 + $0x1], 1 }
  0xe7   :  { %423 = vsyncpa [#allocation6], 1 }
  0xe8   :  { %425 = vsyncpa [#allocation6 + $0x1], 1 }
  0xe9   :  { %426 = vsyncpa [#allocation9], 1 }
  0xea   :  { %427 = vsyncpa [#allocation4], 1 }
  0xeb   :  { %429 = vsyncpa [#allocation4 + $0x1], 1 }

</bundles_post_ra>
